<compile_context>
chip_gen: v7x
topology: tpu7x:2x2x1
jax: 0.10.0
libtpu: 0.0.40
codegen_flags: <defaults>
</compile_context>

<pallas_src>
import jax
import jax.numpy as jnp
from jax.experimental import pallas as pl
from jax.experimental.pallas import tpu as pltpu

N_CELLS = 6 * 7                  # 42 board positions
N_CLASSES = 3                    # empty / player1 / player2
IN_FEATS = N_CELLS * N_CLASSES   # 126
H1 = 256
H2 = 128
N_POLICY = 7
N_VALUE = 1
N_HEAD = N_POLICY + N_VALUE      # 8 (merged policy|value head)
MAX_TB = 1024                    # batch tile (multiple of 8; safe for 64 MiB v7x VMEM)


def _round_up(x, m):
    return (x + m - 1) // m * m


def _az_kernel(board_ref, w1_ref, b1_ref, w2_ref, b2_ref, wh_ref, bh_ref, out_ref):
    board = board_ref[...]                                   # (TB, 42) int32

    # ---- fused one-hot + fc1 + relu ----------------------------------------
    # onehot(board) @ W1  ==  sum_c (board == c) @ W1[c]
    h1 = b1_ref[...]                                         # (1, 256), broadcasts
    for c in range(N_CLASSES):
        xc = (board == c).astype(jnp.float32)                # (TB, 42)
        h1 = h1 + jnp.dot(xc, w1_ref[c], preferred_element_type=jnp.float32)
    h1 = jnp.maximum(h1, 0.0)                                # (TB, 256)

    # ---- fc2 + relu ---------------------------------------------------------
    h2 = jnp.dot(h1, w2_ref[...], preferred_element_type=jnp.float32) + b2_ref[...]
    h2 = jnp.maximum(h2, 0.0)                                # (TB, 128)

    # ---- merged heads: lanes 0..6 = policy logits, lane 7 = value logit ----
    logits = jnp.dot(h2, wh_ref[...], preferred_element_type=jnp.float32) + bh_ref[...]
    lane = jax.lax.broadcasted_iota(jnp.int32, logits.shape, 1)
    is_pol = lane < N_POLICY

    # softmax over the 7 policy lanes only
    m = jnp.max(jnp.where(is_pol, logits, -jnp.inf), axis=-1, keepdims=True)
    e = jnp.exp(jnp.where(is_pol, logits - m, -jnp.inf))     # exp(-inf) == 0
    inv = pl.reciprocal(jnp.sum(e, axis=-1, keepdims=True), approx=False)

    # single lane-packed output slab: [softmax(policy) | tanh(value)]
    out_ref[...] = jnp.where(is_pol, e * inv, jnp.tanh(logits))


@jax.jit
def alphazero_forward(board, params):
    """board: (B, 6, 7) int in {0,1,2}.  Returns (policy (B,7), value (B,1))."""
    B = board.shape[0]
    board2d = board.reshape(B, N_CELLS).astype(jnp.int32)

    # Batch tiling: pad B up so every tile is full (multiple of 8 sublanes).
    TB = min(MAX_TB, _round_up(B, 8))
    Bp = _round_up(B, TB)
    if Bp != B:
        board2d = jnp.pad(board2d, ((0, Bp - B), (0, 0)))
    grid = (Bp // TB,)

    # Kernel-layout params (tiny, one-time transforms).
    # w1 rows are indexed by p*3 + c (PyTorch one-hot layout) -> class-split (3, 42, 256).
    w1k = params["w1"].reshape(N_CELLS, N_CLASSES, H1).transpose(1, 0, 2)
    wh = jnp.concatenate([params["wp"], params["wv"]], axis=1)   # (128, 8)
    bh = jnp.concatenate([params["bp"], params["bv"]], axis=1)   # (1, 8)

    def resident(shape):
        n = len(shape)
        return pl.BlockSpec(shape, lambda i: (0,) * n)   # same block every step -> stays in VMEM

    in_specs = [
        pl.BlockSpec((TB, N_CELLS), lambda i: (i, 0)),   # board tile, pipelined over batch
        resident((N_CLASSES, N_CELLS, H1)),              # w1 (class-split)
        resident((1, H1)),                               # b1
        resident((H1, H2)),                              # w2
        resident((1, H2)),                               # b2
        resident((H2, N_HEAD)),                          # merged head weight
        resident((1, N_HEAD)),                           # merged head bias
    ]
    out_specs = pl.BlockSpec((TB, N_HEAD), lambda i: (i, 0))

    flops = 2 * Bp * (IN_FEATS * H1 + H1 * H2 + H2 * N_HEAD)
    transcendentals = Bp * 2 * N_HEAD                    # exp + tanh per row (approx)
    weight_bytes = 4 * (IN_FEATS * H1 + H1 + H1 * H2 + H2 + H2 * N_HEAD + N_HEAD)
    bytes_accessed = Bp * (N_CELLS * 4 + N_HEAD * 4) + weight_bytes

    out = pl.pallas_call(
        _az_kernel,
        out_shape=jax.ShapeDtypeStruct((Bp, N_HEAD), jnp.float32),
        grid=grid,
        in_specs=in_specs,
        out_specs=out_specs,
        compiler_params=pltpu.CompilerParams(
            dimension_semantics=("parallel",),
        ),
        cost_estimate=pl.CostEstimate(
            flops=flops,
            transcendentals=transcendentals,
            bytes_accessed=bytes_accessed,
        ),
    )(board2d, w1k, params["b1"], params["w2"], params["b2"], wh, bh)

    policy = out[:B, :N_POLICY]
    value = out[:B, N_POLICY:]
    return policy, value


def init_params(key):
    """Deterministic synthetic parameters (shapes match the nn.Module, stored (in, out))."""
    ks = jax.random.split(key, 8)

    def unif(k, shape, fan_in):
        bound = 1.0 / jnp.sqrt(fan_in)
        return jax.random.uniform(k, shape, jnp.float32, -bound, bound)

    return {
        "w1": unif(ks[0], (IN_FEATS, H1), IN_FEATS),
        "b1": unif(ks[1], (1, H1), IN_FEATS),
        "w2": unif(ks[2], (H1, H2), H1),
        "b2": unif(ks[3], (1, H2), H1),
        "wp": unif(ks[4], (H2, N_POLICY), H2),
        "bp": unif(ks[5], (1, N_POLICY), H2),
        "wv": unif(ks[6], (H2, N_VALUE), H2),
        "bv": unif(ks[7], (1, N_VALUE), H2),
    }


def _reference_forward(board, params):
    """Pure-JAX reference of the PyTorch forward for validation."""
    b = board.shape[0]
    x = jax.nn.one_hot(board.astype(jnp.int32), N_CLASSES, dtype=jnp.float32)
    x = x.reshape(b, IN_FEATS)
    h1 = jax.nn.relu(x @ params["w1"] + params["b1"])
    h2 = jax.nn.relu(h1 @ params["w2"] + params["b2"])
    policy = jax.nn.softmax(h2 @ params["wp"] + params["bp"], axis=1)
    value = jnp.tanh(h2 @ params["wv"] + params["bv"])
    return policy, value


if __name__ == "__main__":
    key = jax.random.PRNGKey(0)
    pkey, bkey1, bkey2 = jax.random.split(key, 3)
    params = init_params(pkey)

    # Small primary case (batch=2).
    board = jax.random.randint(bkey1, (2, 6, 7), 0, 3, dtype=jnp.int32)
    policy, value = alphazero_forward(board, params)
    jax.block_until_ready((policy, value))

    ref_policy, ref_value = _reference_forward(board, params)
    assert policy.shape == (2, N_POLICY) and value.shape == (2, N_VALUE)
    assert jnp.allclose(policy, ref_policy, atol=1e-5, rtol=1e-5)
    assert jnp.allclose(value, ref_value, atol=1e-5, rtol=1e-5)
    assert jnp.allclose(jnp.sum(policy, axis=1), 1.0, atol=1e-5)

    # Ragged larger batch: exercises multi-tile grid + tail padding path.
    board_big = jax.random.randint(bkey2, (2500, 6, 7), 0, 3, dtype=jnp.int32)
    policy_b, value_b = alphazero_forward(board_big, params)
    jax.block_until_ready((policy_b, value_b))

    ref_policy_b, ref_value_b = _reference_forward(board_big, params)
    assert policy_b.shape == (2500, N_POLICY) and value_b.shape == (2500, N_VALUE)
    assert jnp.allclose(policy_b, ref_policy_b, atol=1e-5, rtol=1e-5)
    assert jnp.allclose(value_b, ref_value_b, atol=1e-5, rtol=1e-5)

    print("KERNEL_OK")
</pallas_src>

<mosaic_0001>
module attributes {stable_mosaic.version = 11 : i64} {
  func.func @_az_kernel(%arg0: i32, %arg1: memref<8x42xi32, #tpu.memory_space<vmem>>, %arg2: memref<3x42x256xf32, #tpu.memory_space<vmem>>, %arg3: memref<1x256xf32, #tpu.memory_space<vmem>>, %arg4: memref<256x128xf32, #tpu.memory_space<vmem>>, %arg5: memref<1x128xf32, #tpu.memory_space<vmem>>, %arg6: memref<128x8xf32, #tpu.memory_space<vmem>>, %arg7: memref<1x8xf32, #tpu.memory_space<vmem>>, %arg8: memref<8x8xf32, #tpu.memory_space<vmem>>) attributes {dimension_semantics = [#tpu.dimension_semantics<parallel>], iteration_bounds = array<i64: 1>, scalar_prefetch = 0 : i64, scratch_operands = 0 : i64, tpu.core_type = #tpu.core_type<tc>, window_params = [{transform_indices = @transform_0, window_bounds = array<i64: 8, 42>}, {pipeline_mode = #tpu.pipeline_mode<synchronous>, transform_indices = @transform_1, window_bounds = array<i64: 3, 42, 256>}, {pipeline_mode = #tpu.pipeline_mode<synchronous>, transform_indices = @transform_2, window_bounds = array<i64: 1, 256>}, {pipeline_mode = #tpu.pipeline_mode<synchronous>, transform_indices = @transform_3, window_bounds = array<i64: 256, 128>}, {pipeline_mode = #tpu.pipeline_mode<synchronous>, transform_indices = @transform_4, window_bounds = array<i64: 1, 128>}, {pipeline_mode = #tpu.pipeline_mode<synchronous>, transform_indices = @transform_5, window_bounds = array<i64: 128, 8>}, {pipeline_mode = #tpu.pipeline_mode<synchronous>, transform_indices = @transform_6, window_bounds = array<i64: 1, 8>}, {transform_indices = @transform_7, window_bounds = array<i64: 8, 8>}]} {
    %c0 = arith.constant 0 : index
    %c0_0 = arith.constant 0 : index
    %0 = vector.load %arg1[%c0, %c0_0] : memref<8x42xi32, #tpu.memory_space<vmem>>, vector<8x42xi32>
    %c0_1 = arith.constant 0 : index
    %c0_2 = arith.constant 0 : index
    %1 = vector.load %arg3[%c0_1, %c0_2] : memref<1x256xf32, #tpu.memory_space<vmem>>, vector<1x256xf32>
    %c0_i32 = arith.constant 0 : i32
    %2 = vector.broadcast %c0_i32 : i32 to vector<8x42xi32>
    %3 = arith.cmpi eq, %0, %2 : vector<8x42xi32>
    %4 = arith.extui %3 : vector<8x42xi1> to vector<8x42xi32>
    %5 = arith.sitofp %4 : vector<8x42xi32> to vector<8x42xf32>
    %c0_3 = arith.constant 0 : index
    %c0_4 = arith.constant 0 : index
    %c0_5 = arith.constant 0 : index
    %6 = vector.load %arg2[%c0_3, %c0_4, %c0_5] : memref<3x42x256xf32, #tpu.memory_space<vmem>>, vector<1x42x256xf32>
    %7 = vector.shape_cast %6 : vector<1x42x256xf32> to vector<42x256xf32>
    %cst = arith.constant dense<0.000000e+00> : vector<8x256xf32>
    %8 = tpu.matmul %5, %7, %cst {dimension_numbers = #tpu.dot_dimension_numbers<[1], [0], [0], [1], [0, 0, 1, 1], [], []>} : vector<8x42xf32>, vector<42x256xf32>, vector<8x256xf32> -> vector<8x256xf32>
    %9 = vector.broadcast %1 : vector<1x256xf32> to vector<8x256xf32>
    %10 = arith.addf %9, %8 : vector<8x256xf32>
    %c1_i32 = arith.constant 1 : i32
    %11 = vector.broadcast %c1_i32 : i32 to vector<8x42xi32>
    %12 = arith.cmpi eq, %0, %11 : vector<8x42xi32>
    %13 = arith.extui %12 : vector<8x42xi1> to vector<8x42xi32>
    %14 = arith.sitofp %13 : vector<8x42xi32> to vector<8x42xf32>
    %c1 = arith.constant 1 : index
    %c0_6 = arith.constant 0 : index
    %c0_7 = arith.constant 0 : index
    %15 = vector.load %arg2[%c1, %c0_6, %c0_7] : memref<3x42x256xf32, #tpu.memory_space<vmem>>, vector<1x42x256xf32>
    %16 = vector.shape_cast %15 : vector<1x42x256xf32> to vector<42x256xf32>
    %cst_8 = arith.constant dense<0.000000e+00> : vector<8x256xf32>
    %17 = tpu.matmul %14, %16, %cst_8 {dimension_numbers = #tpu.dot_dimension_numbers<[1], [0], [0], [1], [0, 0, 1, 1], [], []>} : vector<8x42xf32>, vector<42x256xf32>, vector<8x256xf32> -> vector<8x256xf32>
    %18 = arith.addf %10, %17 : vector<8x256xf32>
    %c2_i32 = arith.constant 2 : i32
    %19 = vector.broadcast %c2_i32 : i32 to vector<8x42xi32>
    %20 = arith.cmpi eq, %0, %19 : vector<8x42xi32>
    %21 = arith.extui %20 : vector<8x42xi1> to vector<8x42xi32>
    %22 = arith.sitofp %21 : vector<8x42xi32> to vector<8x42xf32>
    %c2 = arith.constant 2 : index
    %c0_9 = arith.constant 0 : index
    %c0_10 = arith.constant 0 : index
    %23 = vector.load %arg2[%c2, %c0_9, %c0_10] : memref<3x42x256xf32, #tpu.memory_space<vmem>>, vector<1x42x256xf32>
    %24 = vector.shape_cast %23 : vector<1x42x256xf32> to vector<42x256xf32>
    %cst_11 = arith.constant dense<0.000000e+00> : vector<8x256xf32>
    %25 = tpu.matmul %22, %24, %cst_11 {dimension_numbers = #tpu.dot_dimension_numbers<[1], [0], [0], [1], [0, 0, 1, 1], [], []>} : vector<8x42xf32>, vector<42x256xf32>, vector<8x256xf32> -> vector<8x256xf32>
    %26 = arith.addf %18, %25 : vector<8x256xf32>
    %cst_12 = arith.constant 0.000000e+00 : f32
    %27 = vector.broadcast %cst_12 : f32 to vector<8x256xf32>
    %28 = arith.maximumf %26, %27 : vector<8x256xf32>
    %c0_13 = arith.constant 0 : index
    %c0_14 = arith.constant 0 : index
    %29 = vector.load %arg4[%c0_13, %c0_14] : memref<256x128xf32, #tpu.memory_space<vmem>>, vector<256x128xf32>
    %cst_15 = arith.constant dense<0.000000e+00> : vector<8x128xf32>
    %30 = tpu.matmul %28, %29, %cst_15 {dimension_numbers = #tpu.dot_dimension_numbers<[1], [0], [0], [1], [0, 0, 1, 1], [], []>} : vector<8x256xf32>, vector<256x128xf32>, vector<8x128xf32> -> vector<8x128xf32>
    %c0_16 = arith.constant 0 : index
    %c0_17 = arith.constant 0 : index
    %31 = vector.load %arg5[%c0_16, %c0_17] : memref<1x128xf32, #tpu.memory_space<vmem>>, vector<1x128xf32>
    %32 = vector.broadcast %31 : vector<1x128xf32> to vector<8x128xf32>
    %33 = arith.addf %30, %32 : vector<8x128xf32>
    %cst_18 = arith.constant 0.000000e+00 : f32
    %34 = vector.broadcast %cst_18 : f32 to vector<8x128xf32>
    %35 = arith.maximumf %33, %34 : vector<8x128xf32>
    %c0_19 = arith.constant 0 : index
    %c0_20 = arith.constant 0 : index
    %36 = vector.load %arg6[%c0_19, %c0_20] : memref<128x8xf32, #tpu.memory_space<vmem>>, vector<128x8xf32>
    %cst_21 = arith.constant dense<0.000000e+00> : vector<8x8xf32>
    %37 = tpu.matmul %35, %36, %cst_21 {dimension_numbers = #tpu.dot_dimension_numbers<[1], [0], [0], [1], [0, 0, 1, 1], [], []>} : vector<8x128xf32>, vector<128x8xf32>, vector<8x8xf32> -> vector<8x8xf32>
    %c0_22 = arith.constant 0 : index
    %c0_23 = arith.constant 0 : index
    %38 = vector.load %arg7[%c0_22, %c0_23] : memref<1x8xf32, #tpu.memory_space<vmem>>, vector<1x8xf32>
    %39 = vector.broadcast %38 : vector<1x8xf32> to vector<8x8xf32>
    %40 = arith.addf %37, %39 : vector<8x8xf32>
    %41 = tpu.iota {dimensions = array<i32: 1>} : vector<8x8xi32>
    %c7_i32 = arith.constant 7 : i32
    %42 = vector.broadcast %c7_i32 : i32 to vector<8x8xi32>
    %43 = arith.cmpi slt, %41, %42 : vector<8x8xi32>
    %cst_24 = arith.constant 0xFF800000 : f32
    %44 = vector.broadcast %cst_24 : f32 to vector<8x8xf32>
    %45 = arith.select %43, %40, %44 : vector<8x8xi1>, vector<8x8xf32>
    %cst_25 = arith.constant dense<0xFF800000> : vector<8xf32>
    %46 = vector.multi_reduction <maximumf>, %45, %cst_25 [1] : vector<8x8xf32> to vector<8xf32>
    %47 = vector.shape_cast %46 : vector<8xf32> to vector<8x1xf32>
    %48 = vector.broadcast %47 : vector<8x1xf32> to vector<8x8xf32>
    %49 = arith.subf %40, %48 : vector<8x8xf32>
    %cst_26 = arith.constant 0xFF800000 : f32
    %50 = vector.broadcast %cst_26 : f32 to vector<8x8xf32>
    %51 = arith.select %43, %49, %50 : vector<8x8xi1>, vector<8x8xf32>
    %52 = math.exp %51 : vector<8x8xf32>
    %cst_27 = arith.constant dense<0.000000e+00> : vector<8xf32>
    %53 = vector.multi_reduction <add>, %52, %cst_27 [1] : vector<8x8xf32> to vector<8xf32>
    %54 = vector.shape_cast %53 : vector<8xf32> to vector<8x1xf32>
    %55 = tpu.reciprocal %54 : vector<8x1xf32> -> vector<8x1xf32>
    %56 = vector.broadcast %55 : vector<8x1xf32> to vector<8x8xf32>
    %57 = arith.mulf %52, %56 : vector<8x8xf32>
    %58 = math.tanh %40 : vector<8x8xf32>
    %59 = arith.select %43, %57, %58 : vector<8x8xi1>, vector<8x8xf32>
    %c0_28 = arith.constant 0 : index
    %c0_29 = arith.constant 0 : index
    %60 = vector.load %arg8[%c0_28, %c0_29] : memref<8x8xf32, #tpu.memory_space<vmem>>, vector<8x8xf32>
    tpu.vector_store %arg8[%c0_28, %c0_29], %59 {strides = array<i32>} : memref<8x8xf32, #tpu.memory_space<vmem>>, vector<8x8xf32>,
    return
  }
  func.func @transform_0(%arg0: i32) -> (i32, i32) {
    %c0_i32 = arith.constant 0 : i32
    %c0_i32_0 = arith.constant 0 : i32
    return %arg0, %c0_i32 : i32, i32
  }
  func.func @transform_1(%arg0: i32) -> (i32, i32, i32) {
    %c0_i32 = arith.constant 0 : i32
    %c0_i32_0 = arith.constant 0 : i32
    %c0_i32_1 = arith.constant 0 : i32
    %c0_i32_2 = arith.constant 0 : i32
    return %c0_i32, %c0_i32_0, %c0_i32_1 : i32, i32, i32
  }
  func.func @transform_2(%arg0: i32) -> (i32, i32) {
    %c0_i32 = arith.constant 0 : i32
    %c0_i32_0 = arith.constant 0 : i32
    %c0_i32_1 = arith.constant 0 : i32
    return %c0_i32, %c0_i32_0 : i32, i32
  }
  func.func @transform_3(%arg0: i32) -> (i32, i32) {
    %c0_i32 = arith.constant 0 : i32
    %c0_i32_0 = arith.constant 0 : i32
    %c0_i32_1 = arith.constant 0 : i32
    return %c0_i32, %c0_i32_0 : i32, i32
  }
  func.func @transform_4(%arg0: i32) -> (i32, i32) {
    %c0_i32 = arith.constant 0 : i32
    %c0_i32_0 = arith.constant 0 : i32
    %c0_i32_1 = arith.constant 0 : i32
    return %c0_i32, %c0_i32_0 : i32, i32
  }
  func.func @transform_5(%arg0: i32) -> (i32, i32) {
    %c0_i32 = arith.constant 0 : i32
    %c0_i32_0 = arith.constant 0 : i32
    %c0_i32_1 = arith.constant 0 : i32
    return %c0_i32, %c0_i32_0 : i32, i32
  }
  func.func @transform_6(%arg0: i32) -> (i32, i32) {
    %c0_i32 = arith.constant 0 : i32
    %c0_i32_0 = arith.constant 0 : i32
    %c0_i32_1 = arith.constant 0 : i32
    return %c0_i32, %c0_i32_0 : i32, i32
  }
  func.func @transform_7(%arg0: i32) -> (i32, i32) {
    %c0_i32 = arith.constant 0 : i32
    %c0_i32_0 = arith.constant 0 : i32
    return %arg0, %c0_i32 : i32, i32
  }
}

</mosaic_0001>

<bundles_post_ra>
// kernel: alphazero_forward.1
= control target key start
LH: loop header
LB: loop body
LE: loop exit
PB: predicated region body
PF: predicated region fallthrough
CT: control target
= control target key end

     0   :  { %v802_v3 = vmov 0.0   ;;  %vm47_vm0 = vcmask 1041408   ;;  %vm803_vm1 = vmmov 1   ;;  %vm43_vm4 = vcmask 343040   ;;  %s1152_s1 = inlined_call_operand.vmem [shape: f32[3,42,256], index: 1, kind: input, shape index: {}]   ;;  %s1153_s0 = inlined_call_operand.vmem [shape: s32[8,42], index: 0, kind: input, shape index: {}]   ;;  %s1154_s3 = inlined_call_operand.vmem [shape: f32[256,128], index: 3, kind: input, shape index: {}]   ;;  %s1155_s2 = inlined_call_operand.vmem [shape: f32[1,256], index: 2, kind: input, shape index: {}]   ;;  %s1156_s5 = inlined_call_operand.vmem [shape: f32[128,8], index: 5, kind: input, shape index: {}]   ;;  %s1157_s4 = inlined_call_operand.vmem [shape: f32[1,128], index: 4, kind: input, shape index: {}]   ;;  %s1158_s6 = inlined_call_operand.vmem [shape: f32[1,8], index: 6, kind: input, shape index: {}]   ;;  %s1159_s7 = inlined_call_operand.vmem [shape: f32[8,8], index: 7, kind: output, shape index: {}]  }
   0x1   :  { %v32_v0 = vld [vmem:[%s1152_s1 + $0x8] sm:$0xff]  ;;  %v34_v1 = vld [vmem:[%s1152_s1 + $0x18] sm:$0xff]  ;;  %v31_v2 = vld [vmem:[%s1152_s1] sm:$0xff]  ;;  %118 = vmatprep.mubr.f32.mxu0 %v802_v3  ;;  %vm805_vm7 = vmmov 0   ;;  %vm543_vm9 = vcmask 64512  }
   0x2   :  { %v688_v4 = vpack.c.bf16 %v34_v1, %v32_v0  ;;  %v33_v5 = vld [vmem:[%s1152_s1 + $0x10] sm:$0xff]  ;;  %v36_v6 = vld [vmem:[%s1152_s1 + $0x28] sm:$0xff]  ;;  %v38_v7 = vld [vmem:[%s1152_s1 + $0x38] sm:$0xff] }
   0x3   :  { %v690_v8 = vpack.c.bf16 %v33_v5, %v31_v2  ;;  %v692_v9 = vpack.c.bf16 %v38_v7, %v36_v6  ;;  %v35_v10 = vld [vmem:[%s1152_s1 + $0x20] sm:$0xff]  ;;  %v37_v11 = vld [vmem:[%s1152_s1 + $0x30] sm:$0xff]  ;;  %v40_v12 = vld [vmem:[%s1152_s1 + $0x48] sm:$0xff] }
   0x4   :  { %689 = vmatprep.subr.bf16.mxu0 %v688_v4  ;;  %v42_v13 = vld [vmem:[%s1152_s1 + $0x58] sm:$0x3]  ;;  %v694_v14 = vpack.c.bf16 %v37_v11, %v35_v10  ;;  %vm877_vm2 = vmpackc.low %vm47_vm0, %vm803_vm1  ;;  %v39_v17 = vld [vmem:[%s1152_s1 + $0x40] sm:$0xff] }
   0x5   :  { %691 = vmatpush1.bf16.msra.mxu0 %v690_v8  ;;  %v696_v15 = vpack.c.bf16 %v42_v13, %v40_v12  ;;  %v41_v18 = vld [vmem:[%s1152_s1 + $0x50] sm:$0x3]  ;;  %v569_v19 = vld [vmem:[%s1152_s1 + $0x68] sm:$0xff]  ;;  %v571_v20 = vld [vmem:[%s1152_s1 + $0x78] sm:$0xff] }
   0x6   :  { %693 = vmatprep.subr.bf16.mxu0 %v692_v9  ;;  %v896_v21 = vld [vmem:[%s1153_s0] sm:$0xff]  ;;  %v699_v22 = vpack.c.bf16 %v41_v18, %v39_v17  ;;  %v702_v23 = vpack.c.bf16 %v571_v20, %v569_v19  ;;  %v570_v25 = vld [vmem:[%s1152_s1 + $0x70] sm:$0xff]  ;;  %v573_v26 = vld [vmem:[%s1152_s1 + $0x88] sm:$0xff] }
   0x7   :  { %vm28_vm3 = vcmp.eq.s32.totalorder %v896_v21, 0  ;;  %v568_v24 = vld [vmem:[%s1152_s1 + $0x60] sm:$0xff]  ;;  %v575_v27 = vld [vmem:[%s1152_s1 + $0x98] sm:$0xff]  ;;  %v574_v31 = vld [vmem:[%s1152_s1 + $0x90] sm:$0xff]  ;;  %vm138_vm5 = vcmp.eq.s32.totalorder %v896_v21, 1  ;;  %vm236_vm6 = vcmp.eq.s32.totalorder %v896_v21, 2 }
   0x8   :  { %v572_v28 = vld [vmem:[%s1152_s1 + $0x80] sm:$0xff]  ;;  %v563_v29 = vsel %vm28_vm3, 1.0, %v802_v3  ;;  %v704_v30 = vpack.c.bf16 %v570_v25, %v568_v24  ;;  %v577_v32 = vld [vmem:[%s1152_s1 + $0xa8] sm:$0xff]  ;;  %v706_v34 = vpack.c.bf16 %v575_v27, %v573_v26  ;;  %v579_v38 = vld [vmem:[%s1152_s1 + $0xb8] sm:$0x3]  ;;  %v567_v7 = vsel %vm138_vm5, 1.0, %v802_v3 }
   0x9   :  { %695 = vmatpush1.bf16.msra.mxu0 %v694_v14  ;;  %v352_v33 = vld [vmem:[%s1154_s3 + $0x80] sm:$0xff]  ;;  %v353_v35 = vld [vmem:[%s1154_s3 + $0x88] sm:$0xff]  ;;  %v354_v41 = vld [vmem:[%s1154_s3 + $0x90] sm:$0xff]  ;;  %v708_v46 = vpack.c.bf16 %v574_v31, %v572_v28  ;;  %v710_v49 = vpack.c.bf16 %v579_v38, %v577_v32 }
   0xa   :  { %698 = vmatprep.subr.msk.bf16.mxu0 %vm877_vm2, %v696_v15  ;;  %v336_v36 = vld [vmem:[%s1154_s3] sm:$0xff]  ;;  %v337_v37 = vld [vmem:[%s1154_s3 + $0x8] sm:$0xff]  ;;  %v730_v39 = vpack.c.bf16 %v353_v35, %v352_v33  ;;  %v355_v42 = vld [vmem:[%s1154_s3 + $0x98] sm:$0xff] }
   0xb   :  { %v732_v40 = vpack.c.bf16 %v337_v37, %v336_v36  ;;  %v734_v43 = vpack.c.bf16 %v355_v42, %v354_v41  ;;  %v338_v44 = vld [vmem:[%s1154_s3 + $0x10] sm:$0xff]  ;;  %v339_v45 = vld [vmem:[%s1154_s3 + $0x18] sm:$0xff]  ;;  %v356_v47 = vld [vmem:[%s1154_s3 + $0xa0] sm:$0xff]  ;;  %v583_v37 = vsel %vm236_vm6, 1.0, %v802_v3 }
   0xc   :  { %v357_v48 = vld [vmem:[%s1154_s3 + $0xa8] sm:$0xff]  ;;  %v576_v50 = vld [vmem:[%s1152_s1 + $0xa0] sm:$0xff]  ;;  %v578_v51 = vld [vmem:[%s1152_s1 + $0xb0] sm:$0x3]  ;;  %731 = vmatprep.subr.bf16.mxu1 %v730_v39  ;;  %v736_v54 = vpack.c.bf16 %v339_v45, %v338_v44  ;;  %v804_v45 = vmov 0.0|0.0  }
   0xd   :  { %701 = vmatpush1.bf16.msk.msra.mxu0 %vm877_vm2, %v699_v22  ;;  %v585_v52 = vld [vmem:[%s1152_s1 + $0xc8] sm:$0xff]  ;;  %v587_v53 = vld [vmem:[%s1152_s1 + $0xd8] sm:$0xff]  ;;  %733 = vmatpush3.bf16.msra.mxu1 %v732_v40  ;;  %v738_v55 = vpack.c.bf16 %v357_v48, %v356_v47  ;;  %v340_v56 = vld [vmem:[%s1154_s3 + $0x20] sm:$0xff]  ;;  %v713_v58 = vpack.c.bf16 %v578_v51, %v576_v50 }
   0xe   :  { %703 = vmatprep.subr.bf16.mxu0 %v702_v23  ;;  %735 = vmatprep.subr.bf16.mxu1 %v734_v43  ;;  %v341_v57 = vld [vmem:[%s1154_s3 + $0x28] sm:$0xff]  ;;  %v358_v59 = vld [vmem:[%s1154_s3 + $0xb0] sm:$0xff]  ;;  %v359_v60 = vld [vmem:[%s1154_s3 + $0xb8] sm:$0xff]  ;;  %v716_v61 = vpack.c.bf16 %v587_v53, %v585_v52 }
   0xf   :  { %v584_v62 = vld [vmem:[%s1152_s1 + $0xc0] sm:$0xff]  ;;  %v586_v63 = vld [vmem:[%s1152_s1 + $0xd0] sm:$0xff]  ;;  %v589_v0 = vld [vmem:[%s1152_s1 + $0xe8] sm:$0xff]  ;;  %v740_v2 = vpack.c.bf16 %v341_v57, %v340_v56  ;;  %v742_v4 = vpack.c.bf16 %v359_v60, %v358_v59 }
  0x10   :  { %566 = vmatmul.mubr.msk.f32.vlgmr.msra.gmra.mrb[0].mxu0 %vm43_vm4, %v563_v29  ;;  %v591_v1 = vld [vmem:[%s1152_s1 + $0xf8] sm:$0xff]  ;;  %v342_v5 = vld [vmem:[%s1154_s3 + $0x30] sm:$0xff]  ;;  %v718_v8 = vpack.c.bf16 %v586_v63, %v584_v62  ;;  %v360_v9 = vld [vmem:[%s1154_s3 + $0xc0] sm:$0xff] }
  0x11   :  { %705 = vmatpush1.bf16.msra.mxu0 %v704_v30  ;;  %227 = vmatprep.mubr.f32.mxu0 %v802_v3  ;;  %v343_v6 = vld [vmem:[%s1154_s3 + $0x38] sm:$0xff]  ;;  %v361_v10 = vld [vmem:[%s1154_s3 + $0xc8] sm:$0xff]  ;;  %v720_v11 = vpack.c.bf16 %v591_v1, %v589_v0  ;;  %v588_v12 = vld [vmem:[%s1152_s1 + $0xe0] sm:$0xff] }
  0x12   :  { %707 = vmatprep.subr.bf16.mxu0 %v706_v34  ;;  %737 = vmatpush3.bf16.msra.mxu1 %v736_v54  ;;  %v590_v13 = vld [vmem:[%s1152_s1 + $0xf0] sm:$0xff]  ;;  %v593_v14 = vld [vmem:[%s1152_s1 + $0x108] sm:$0xff]  ;;  %v595_v15 = vld [vmem:[%s1152_s1 + $0x118] sm:$0x3]  ;;  %v744_v17 = vpack.c.bf16 %v343_v6, %v342_v5  ;;  %v746_v18 = vpack.c.bf16 %v361_v10, %v360_v9 }
  0x13   :  { %739 = vmatprep.subr.bf16.mxu1 %v738_v55  ;;  %v344_v19 = vld [vmem:[%s1154_s3 + $0x40] sm:$0xff]  ;;  %v345_v20 = vld [vmem:[%s1154_s3 + $0x48] sm:$0xff]  ;;  %v722_v22 = vpack.c.bf16 %v590_v13, %v588_v12  ;;  %v362_v23 = vld [vmem:[%s1154_s3 + $0xd0] sm:$0xff]  ;;  %v724_v25 = vpack.c.bf16 %v595_v15, %v593_v14 }
  0x14   :  { %v363_v24 = vld [vmem:[%s1154_s3 + $0xd8] sm:$0xff]  ;;  %v592_v26 = vld [vmem:[%s1152_s1 + $0x100] sm:$0xff]  ;;  %v594_v27 = vld [vmem:[%s1152_s1 + $0x110] sm:$0x3]  ;;  %v748_v28 = vpack.c.bf16 %v345_v20, %v344_v19 }
  0x15   :  { %709 = vmatpush1.bf16.msra.mxu0 %v708_v46  ;;  %v750_v29 = vpack.c.bf16 %v363_v24, %v362_v23  ;;  %v346_v30 = vld [vmem:[%s1154_s3 + $0x50] sm:$0xff]  ;;  %v347_v31 = vld [vmem:[%s1154_s3 + $0x58] sm:$0xff]  ;;  %v727_v32 = vpack.c.bf16 %v594_v27, %v592_v26  ;;  %v364_v33 = vld [vmem:[%s1154_s3 + $0xe0] sm:$0xff]  ;;  %v126_v46 = vlaneseq }
  0x16   :  { %712 = vmatprep.subr.msk.bf16.mxu0 %vm877_vm2, %v710_v49  ;;  %741 = vmatpush3.bf16.msra.mxu1 %v740_v2  ;;  %v365_v34 = vld [vmem:[%s1154_s3 + $0xe8] sm:$0xff]  ;;  %v752_v35 = vpack.c.bf16 %v347_v31, %v346_v30  ;;  %v348_v38 = vld [vmem:[%s1154_s3 + $0x60] sm:$0xff]  ;;  %v366_v16 = vld [vmem:[%s1154_s3 + $0xf0] sm:$0xff] }
  0x17   :  { %743 = vmatprep.subr.bf16.mxu1 %v742_v4  ;;  %v754_v36 = vpack.c.bf16 %v365_v34, %v364_v33  ;;  %v349_v21 = vld [vmem:[%s1154_s3 + $0x68] sm:$0xff]  ;;  %v367_v40 = vld [vmem:[%s1154_s3 + $0xf8] sm:$0xff]  ;;  %v350_v42 = vld [vmem:[%s1154_s3 + $0x70] sm:$0xff]  ;;  %v127_v47 = vshrl.u32 %v126_v46, 7 }
  0x18   :  { %v756_v39 = vpack.c.bf16 %v349_v21, %v348_v38  ;;  %v758_v41 = vpack.c.bf16 %v367_v40, %v366_v16  ;;  %v351_v43 = vld [vmem:[%s1154_s3 + $0x78] sm:$0xff]  ;;  %v27_v49 = vld [vmem:[%s1155_s2] sm:$0x3]  ;;  %v447_v57 = vld [vmem:[%s1156_s5 + $0x8] sm:$0xff] }
  0x19   :  { %715 = vmatpush1.bf16.msk.msra.mxu0 %vm877_vm2, %v713_v58  ;;  %v760_v44 = vpack.c.bf16 %v351_v43, %v350_v42  ;;  %v128_v48 = vsub.s32 0, %v127_v47  ;;  %v132_v50 = vsub.s32 1, %v127_v47  ;;  %v446_v56 = vld [vmem:[%s1156_s5] sm:$0xff]  ;;  %v448_v62 = vld [vmem:[%s1156_s5 + $0x10] sm:$0xff]  ;;  %v449_v63 = vld [vmem:[%s1156_s5 + $0x18] sm:$0xff] }
  0x1a   :  { %717 = vmatprep.subr.bf16.mxu0 %v716_v61  ;;  %745 = vmatpush3.bf16.msra.mxu1 %v744_v17  ;;  %v763_v60 = vpack.c.bf16 %v447_v57, %v446_v56  ;;  %v766_v0 = vpack.c.bf16 %v449_v63, %v448_v62  ;;  %v450_v1 = vld [vmem:[%s1156_s5 + $0x20] sm:$0xff]  ;;  %v451_v2 = vld [vmem:[%s1156_s5 + $0x28] sm:$0xff]  ;;  %v452_v5 = vld [vmem:[%s1156_s5 + $0x30] sm:$0xff] }
  0x1b   :  { %747 = vmatprep.subr.bf16.mxu1 %v746_v18  ;;  %v129_v51 = vrot.slane %v27_v49, %v128_v48  ;;  %v133_v52 = vrot.slane %v27_v49, %v132_v50  ;;  %v769_v4 = vpack.c.bf16 %v451_v2, %v450_v1  ;;  %v453_v6 = vld [vmem:[%s1156_s5 + $0x38] sm:$0xff]  ;;  %v455_v9 = vld [vmem:[%s1156_s5 + $0x48] sm:$0xff]  ;;  %v458_v14 = vld [vmem:[%s1156_s5 + $0x60] sm:$0xff] }
  0x1c   :  { %582 = vmatmul.mubr.msk.f32.vlgmr.msra.gmra.mrb[0].mxu0 %vm43_vm4, %v567_v7  ;;  %v772_v7 = vpack.c.bf16 %v453_v6, %v452_v5  ;;  %v457_v12 = vld [vmem:[%s1156_s5 + $0x58] sm:$0xff]  ;;  %v459_v15 = vld [vmem:[%s1156_s5 + $0x68] sm:$0xff]  ;;  %v460_v18 = vld [vmem:[%s1156_s5 + $0x70] sm:$0xff] }
  0x1d   :  { %719 = vmatpush1.bf16.msra.mxu0 %v718_v8  ;;  %325 = vmatprep.mubr.f32.mxu0 %v802_v3  ;;  %v454_v8 = vld [vmem:[%s1156_s5 + $0x40] sm:$0xff]  ;;  %v781_v17 = vpack.c.bf16 %v459_v15, %v458_v14  ;;  %v461_v19 = vld [vmem:[%s1156_s5 + $0x78] sm:$0xff] }
  0x1e   :  { %721 = vmatprep.subr.bf16.mxu0 %v720_v11  ;;  %749 = vmatpush3.bf16.msra.mxu1 %v748_v28  ;;  %v775_v10 = vpack.c.bf16 %v455_v9, %v454_v8  ;;  %v456_v11 = vld [vmem:[%s1156_s5 + $0x50] sm:$0xff]  ;;  %v784_v20 = vpack.c.bf16 %v461_v19, %v460_v18  ;;  %v599_v23 = vld [vmem:[%s1157_s4] ss:$0 sm:$0xff]  ;;  %v540_v28 = vand.u32 127, %v126_v46 }
  0x1f   :  { %751 = vmatprep.subr.bf16.mxu1 %v750_v29  ;;  %v778_v13 = vpack.c.bf16 %v457_v12, %v456_v11  ;;  %v600_v29 = vld [vmem:[%s1158_s6] ss:$0 sm:$0xff] }
  0x20   :  { %vm541_vm8 = vcmp.lt.s32.totalorder %v540_v28, 7 }
  0x21   :  { %723 = vmatpush1.bf16.msra.mxu0 %v722_v22 }
  0x22   :  { %726 = vmatprep.subr.msk.bf16.mxu0 %vm877_vm2, %v724_v25  ;;  %753 = vmatpush3.bf16.msra.mxu1 %v752_v35 }
  0x23   :  { %755 = vmatprep.subr.bf16.mxu1 %v754_v36 }
  0x25   :  { %729 = vmatpush1.bf16.msk.msra.mxu0 %vm877_vm2, %v727_v32 }
  0x26   :  { %757 = vmatpush3.bf16.msra.mxu1 %v756_v39 }
  0x27   :  { %759 = vmatprep.subr.bf16.mxu1 %v758_v41 }
  0x28   :  { %598 = vmatmul.mubr.msk.f32.vlgmr.msra.gmra.mrb[0].mxu0 %vm43_vm4, %v583_v37 }
  0x2a   :  { %761 = vmatpush3.bf16.msra.mxu1 %v760_v44 }
  0x2b   :  { %762 = vmatprep.subr.bf16.mxu1 %v804_v45 }
  0xfb   :  { %v327_v53 = vpop.f32.mrb[0].mxu0 }
  0xfc   :  { %v786_v54 = vadd.f32 %v327_v53, %v129_v51  ;;  %v329_v55 = vpop.f32.mrb[1].mxu0 }
  0xfd   :  { %v787_v58 = vadd.f32 %v329_v55, %v133_v52 }
  0xfe   :  { %v334_v61 = vmax.f32 %v786_v54, 0.0 }
  0xff   :  { %v335_v59 = vmax.f32 %v787_v58, 0.0 }
 0x101   :  { %439 = vmatprep.mubr.f32.mxu1 %v335_v59 }
 0x102   :  { %440 = vmatmul.mubr.f32.vlgmr.msra.gmra.mrb[0].mxu1 %v334_v61 }
 0x103   :  { %764 = vmatpush3.bf16.msra.mxu1 %v763_v60  ;;  %685 = vmatprep.mubr.msk.f32.mxu1 %vm805_vm7, %v802_v3 }
 0x104   :  { %765 = vmatprep.subr.bf16.mxu1 %v804_v45 }
 0x107   :  { %767 = vmatpush3.bf16.msra.mxu1 %v766_v0 }
 0x108   :  { %768 = vmatprep.subr.bf16.mxu1 %v804_v45 }
 0x10b   :  { %770 = vmatpush3.bf16.msra.mxu1 %v769_v4 }
 0x10c   :  { %771 = vmatprep.subr.bf16.mxu1 %v804_v45 }
 0x10f   :  { %773 = vmatpush3.bf16.msra.mxu1 %v772_v7 }
 0x110   :  { %774 = vmatprep.subr.bf16.mxu1 %v804_v45 }
 0x113   :  { %776 = vmatpush3.bf16.msra.mxu1 %v775_v10 }
 0x114   :  { %777 = vmatprep.subr.bf16.mxu1 %v804_v45 }
 0x117   :  { %779 = vmatpush3.bf16.msra.mxu1 %v778_v13 }
 0x118   :  { %780 = vmatprep.subr.bf16.mxu1 %v804_v45 }
 0x11b   :  { %782 = vmatpush3.bf16.msra.mxu1 %v781_v17 }
 0x11c   :  { %783 = vmatprep.subr.bf16.mxu1 %v804_v45 }
 0x11f   :  { %785 = vmatpush3.bf16.msra.mxu1 %v784_v20 }
 0x1d5   :  { %v633_v22 = vpop.f32.mrb[0].mxu1 }
 0x1d6   :  { %v634_v24 = vpop.f32.mrb[1].mxu1 }
 0x1d7   :  { %v635_v25 = vadd.f32 %v634_v24, %v633_v22 }
 0x1d9   :  { %v442_v26 = vadd.f32 %v635_v25, %v599_v23 }
 0x1db   :  { %v445_v27 = vmax.f32 %v442_v26, 0.0 }
 0x1dd   :  { %686 = vmatmul.mubr.f32.vlgmr.msra.gmra.mrb[2].mxu1 %v445_v27 }
 0x2b0   :  { %v535_v30 = vpop.f32.mrb[2].mxu1 }
 0x2b1   :  { %v536_v31 = vadd.f32 %v600_v29, %v535_v30  ;;  %v687_v3 = vpop.f32.mrb[3].mxu1 }
 0x2b3   :  { %v542_v32 = vsel %vm541_vm8, %v536_v31, -inf }
 0x2b4   :  { %v544_v33 = vsel %vm543_vm9, %v542_v32, -inf }
 0x2b5   :  { %545 = vmax.xlane.f32.xlu0 %v544_v33 }
 0x342   :  { %v546_v34 = vpop.xlane.xlu0 %545 }
 0x343   :  { %v547_v35 = vsub.f32 %v536_v31, %v546_v34 }
 0x345   :  { %v548_v36 = vsel %vm541_vm8, %v547_v35, -inf }
 0x346   :  { %v549_v37 = vmul.f32 1.442695, %v548_v36 }
 0x348   :  { %796 = vpow2.f32 %v549_v37 }
 0x352   :  { %v797_v38 = vpop.eup %796 }
 0x353   :  { %v551_v21 = vsel %vm543_vm9, %v797_v38, 0.0 }
 0x354   :  { %552 = vadd.xlane.f32.xlu0 %v551_v21 }
 0x3e1   :  { %v553_v39 = vpop.xlane.xlu0 %552 }
 0x3e2   :  { %798 = vrcp.f32 %v553_v39 }
 0x3e3   :  { %800 = vtanh.f32 %v536_v31 }
 0x3ec   :  { %v799_v16 = vpop.eup %798 }
 0x3ed   :  { %v555_v40 = vmul.f32 %v799_v16, %v797_v38  ;;  %v801_v41 = vpop.eup %800 }
 0x3ef   :  { %v557_v42 = vsel %vm541_vm8, %v555_v40, %v801_v41 }
 0x3f0   :  { %558 = vst.msk [vmem:[%s1159_s7] sm:$0xff] %vm543_vm9, %v557_v42 }

</bundles_post_ra>
